<compile_context>
chip_gen: v7x
topology: tpu7x:2x2x1
jax: 0.10.0
libtpu: 0.0.40
codegen_flags: <defaults>
</compile_context>

<pallas_src>
import jax
import jax.numpy as jnp
from jax.experimental import pallas as pl
from jax.experimental.pallas import tpu as pltpu

# ----------------------------- configuration ---------------------------------------
X_DIM = 16                       # x_dim
Z_DIM = 8                        # z_dim
H = 32                           # ResBlock width (encoder and decoder)
BN_EPS = 1e-5                    # PyTorch BatchNorm1d default
BT_MAX = 256                     # batch tile (conservative for v7x's 64 MiB VMEM)

# packed activation stream: [x | eps_z | eps_x]
IN_PACK = X_DIM + Z_DIM + X_DIM  # 40

# lane-dense packed output: (bt, 128); z_tilde at lanes [0:8), x_tilde at lanes [64:80)
OUT_LANES = 128
Z_OFF = 0
XT_OFF = 64

# weight-slab row offsets (single (W_ROWS, 128) f32 slab; every row start is a multiple of 8)
R_IN = 0                          # rows   0: 40  cols 0:32 enc first linear / cols 32:64 dec eps part
R_RES = R_IN + IN_PACK            # rows  40: 72  cols 0:32 enc ResBlock lin / cols 32:64 dec ResBlock lin
R_OUTE = R_RES + H                # rows  72:104  cols 0:128 enc fused head (lane-padded)
R_OUTD = R_OUTE + H               # rows 104:136  cols 0:128 dec head (lane-padded)
R_ZIN = R_OUTD + H                # rows 136:264  cols 0:32  dec z-part weight (128-row padded)
W_ROWS = R_ZIN + OUT_LANES        # 264


# ----------------------------- Pallas kernel ---------------------------------------
def autoencoder_kernel(xin_ref, w_ref, v_ref, out_ref):
    """Fused encoder+decoder forward for one batch tile (all folds done host-side)."""
    xin = xin_ref[...]                                    # (bt, 40) = [x | eps_z | eps_x]

    def resblock(h, gamma, beta, w, b):
        # BatchNorm1d (training-mode batch stats, biased var) -> ReLU -> Linear, + skip.
        mu = jnp.mean(h, axis=0, keepdims=True)
        var = jnp.mean(jnp.square(h - mu), axis=0, keepdims=True)
        scale = jax.lax.rsqrt(var + BN_EPS) * gamma       # (1, H) per-feature prep; rsqrt -> EUP
        shift = beta - mu * scale
        ha = jnp.maximum(h * scale + shift, 0.0)          # one FMA per element + ReLU
        return jnp.dot(ha, w, preferred_element_type=jnp.float32) + b + h

    # ------------------------------ encoder ------------------------------
    # first linear (x-standardization folded; eps_z rows appended; zero rows for eps_x)
    h = (jnp.dot(xin, w_ref[R_IN:R_RES, 0:H], preferred_element_type=jnp.float32)
         + v_ref[0:1, 0:H])
    h = resblock(h, v_ref[0:1, 2 * H:3 * H], v_ref[0:1, 3 * H:4 * H],
                 w_ref[R_RES:R_OUTE, 0:H], v_ref[1:2, 0:H])
    # fused (32->16->8) head + z un-standardization, lane-padded: z_tilde lives at lanes 0:8
    z_pad = (jnp.dot(h, w_ref[R_OUTE:R_OUTD, :], preferred_element_type=jnp.float32)
             + v_ref[2:3, :])                             # (bt, 128), zero outside lanes 0:8

    # ------------------------------ decoder ------------------------------
    # fused Linear(24,16)@Linear(16,32): z contribution (z-standardization folded, 128-row padded
    # weight so no lane slicing of z_pad is needed) + eps_x contribution + fused bias
    hd = (jnp.dot(z_pad, w_ref[R_ZIN:W_ROWS, 0:H], preferred_element_type=jnp.float32)
          + jnp.dot(xin, w_ref[R_IN:R_RES, H:2 * H], preferred_element_type=jnp.float32)
          + v_ref[0:1, H:2 * H])
    hd = resblock(hd, v_ref[1:2, 2 * H:3 * H], v_ref[1:2, 3 * H:4 * H],
                  w_ref[R_RES:R_OUTE, H:2 * H], v_ref[1:2, H:2 * H])
    # decoder head + x un-standardization, lane-padded: x_tilde lives at lanes 64:80
    x_pad = (jnp.dot(hd, w_ref[R_OUTD:R_ZIN, :], preferred_element_type=jnp.float32)
             + v_ref[3:4, :])                             # (bt, 128), zero outside lanes 64:80

    # single lane-dense, unmasked (bt, 128) store
    out_ref[...] = (z_pad + x_pad).astype(out_ref.dtype)


# ----------------------------- wrapper ----------------------------------------------
def autoencoder_forward(x, eps_z, eps_x, wslab, vslab):
    """Runs Autoencoder.forward; returns (z_tilde, x_tilde)."""
    B = x.shape[0]
    bt = B if B <= BT_MAX else BT_MAX
    assert B % bt == 0, "batch must be a multiple of the batch tile"
    xin = jnp.concatenate([x, eps_z, eps_x], axis=-1)     # one packed activation stream (B, 40)

    out = pl.pallas_call(
        autoencoder_kernel,
        out_shape=jax.ShapeDtypeStruct((B, OUT_LANES), jnp.float32),
        grid_spec=pltpu.PrefetchScalarGridSpec(
            num_scalar_prefetch=0,
            grid=(B // bt,),
            in_specs=[
                pl.BlockSpec((bt, IN_PACK), lambda i: (i, 0)),         # batch-tiled activations
                pl.BlockSpec((W_ROWS, OUT_LANES), lambda i: (0, 0)),   # weight slab: VMEM-resident
                pl.BlockSpec((8, OUT_LANES), lambda i: (0, 0)),        # bias/BN slab: VMEM-resident
            ],
            out_specs=pl.BlockSpec((bt, OUT_LANES), lambda i: (i, 0)),
        ),
        compiler_params=pltpu.CompilerParams(
            dimension_semantics=("parallel",)),            # megacore / v7x two-TC sharding
    )(xin, wslab, vslab)

    z_tilde = out[:, Z_OFF:Z_OFF + Z_DIM]
    x_tilde = out[:, XT_OFF:XT_OFF + X_DIM]
    return z_tilde, x_tilde


# ----------------------------- parameters -------------------------------------------
def init_raw_params(key):
    """Synthetic parameters with the same shapes/inits the PyTorch module would create."""
    ks = jax.random.split(key, 8)

    def lin(k, fan_in, fan_out):
        kw, kb = jax.random.split(k)
        bound = 1.0 / (fan_in ** 0.5)
        w = jax.random.uniform(kw, (fan_in, fan_out), jnp.float32, -bound, bound)
        b = jax.random.uniform(kb, (fan_out,), jnp.float32, -bound, bound)
        return w, b

    p = {}
    # encoder nn
    p["We0"], p["be0"] = lin(ks[0], X_DIM + Z_DIM, H)      # Linear 24 -> 32
    p["gamma_e"], p["beta_e"] = jnp.ones((H,), jnp.float32), jnp.zeros((H,), jnp.float32)
    p["Wre"], p["bre"] = lin(ks[1], H, H)                  # ResBlock Linear 32 -> 32
    p["We2"], p["be2"] = lin(ks[2], H, 16)                 # Linear 32 -> 16
    p["We3"], p["be3"] = lin(ks[3], 16, Z_DIM)             # Linear 16 -> 8
    # decoder nn
    p["Wd0"], p["bd0"] = lin(ks[4], Z_DIM + X_DIM, 16)     # Linear 24 -> 16
    p["Wd1"], p["bd1"] = lin(ks[5], 16, H)                 # Linear 16 -> 32
    p["gamma_d"], p["beta_d"] = jnp.ones((H,), jnp.float32), jnp.zeros((H,), jnp.float32)
    p["Wrd"], p["brd"] = lin(ks[6], H, H)                  # ResBlock Linear 32 -> 32
    p["Wd3"], p["bd3"] = lin(ks[7], H, X_DIM)              # Linear 32 -> 16
    # raw-io statistics (raw_io=True): x_stats = [mean, std], z_stats = [mean, std]
    p["x_mean"] = 0.5 * jnp.arange(X_DIM, dtype=jnp.float32)
    p["x_std"] = 1.0 + 0.1 * jnp.arange(X_DIM, dtype=jnp.float32)
    p["z_mean"] = 0.25 * jnp.arange(Z_DIM, dtype=jnp.float32)
    p["z_std"] = 0.5 + 0.1 * jnp.arange(Z_DIM, dtype=jnp.float32)
    return p


def pack_params(p):
    """Host-side algebraic fusion + packing into two VMEM-resident slabs."""
    x_std = jnp.maximum(p["x_std"], 1e-6)                  # guard std == 0 on the host
    z_std = jnp.maximum(p["z_std"], 1e-6)

    # ---- encoder folds ----
    W0x, W0e = p["We0"][:X_DIM], p["We0"][X_DIM:]
    W_enc_x = W0x / x_std[:, None]                         # (x - mean)/std folded into weight
    b_enc_in = p["be0"] - (p["x_mean"] / x_std) @ W0x
    W23 = p["We2"] @ p["We3"]                              # collapse Linear(32,16)@Linear(16,8)
    b23 = p["be2"] @ p["We3"] + p["be3"]
    Wout_e = W23 * z_std[None, :]                          # output un-standardization folded
    bout_e = b23 * z_std + p["z_mean"]

    # ---- decoder folds ----
    Wd01 = p["Wd0"] @ p["Wd1"]                             # collapse Linear(24,16)@Linear(16,32)
    bd01 = p["bd0"] @ p["Wd1"] + p["bd1"]
    Wz, We_eps = Wd01[:Z_DIM], Wd01[Z_DIM:]
    Wz_f = Wz / z_std[:, None]                             # (z - z_mean)/z_std folded
    b_dec_in = bd01 - (p["z_mean"] / z_std) @ Wz
    Wout_d = p["Wd3"] * x_std[None, :]                     # output un-standardization folded
    bout_d = p["bd3"] * x_std + p["x_mean"]

    # ---- weight slab (W_ROWS, 128) ----
    w = jnp.zeros((W_ROWS, OUT_LANES), jnp.float32)
    w = w.at[R_IN:R_IN + X_DIM, 0:H].set(W_enc_x)                      # enc: x part
    w = w.at[R_IN + X_DIM:R_IN + X_DIM + Z_DIM, 0:H].set(W0e)          # enc: eps_z part
    w = w.at[R_IN + X_DIM + Z_DIM:R_RES, H:2 * H].set(We_eps)          # dec: eps_x part (fused)
    w = w.at[R_RES:R_OUTE, 0:H].set(p["Wre"])                          # enc ResBlock linear
    w = w.at[R_RES:R_OUTE, H:2 * H].set(p["Wrd"])                      # dec ResBlock linear
    w = w.at[R_OUTE:R_OUTD, Z_OFF:Z_OFF + Z_DIM].set(Wout_e)           # enc fused head (lane-padded)
    w = w.at[R_OUTD:R_ZIN, XT_OFF:XT_OFF + X_DIM].set(Wout_d)          # dec head (lane-padded)
    w = w.at[R_ZIN + Z_OFF:R_ZIN + Z_OFF + Z_DIM, 0:H].set(Wz_f)       # dec: z part (row-padded)

    # ---- bias / BN-param slab (8, 128) ----
    v = jnp.zeros((8, OUT_LANES), jnp.float32)
    v = v.at[0, 0:H].set(b_enc_in)
    v = v.at[0, H:2 * H].set(b_dec_in)
    v = v.at[0, 2 * H:3 * H].set(p["gamma_e"])
    v = v.at[0, 3 * H:4 * H].set(p["beta_e"])
    v = v.at[1, 0:H].set(p["bre"])
    v = v.at[1, H:2 * H].set(p["brd"])
    v = v.at[1, 2 * H:3 * H].set(p["gamma_d"])
    v = v.at[1, 3 * H:4 * H].set(p["beta_d"])
    v = v.at[2, Z_OFF:Z_OFF + Z_DIM].set(bout_e)
    v = v.at[3, XT_OFF:XT_OFF + X_DIM].set(bout_d)
    return w, v


# ----------------------------- pure-JAX reference (unfused, mirrors PyTorch) --------
def reference_forward(x, eps_z, eps_x, p):
    hp = jax.lax.Precision.HIGHEST

    def resblock(h, gamma, beta, w, b):
        mu = h.mean(0, keepdims=True)
        var = jnp.square(h - mu).mean(0, keepdims=True)
        hn = (h - mu) * jax.lax.rsqrt(var + BN_EPS) * gamma + beta
        return jnp.dot(jnp.maximum(hn, 0.0), w, precision=hp) + b + h

    # encoder (input_stats=x_stats, output_raw=True)
    xs = (x - p["x_mean"]) / p["x_std"]
    h = jnp.dot(jnp.concatenate([xs, eps_z], -1), p["We0"], precision=hp) + p["be0"]
    h = resblock(h, p["gamma_e"], p["beta_e"], p["Wre"], p["bre"])
    h = jnp.dot(h, p["We2"], precision=hp) + p["be2"]
    h = jnp.dot(h, p["We3"], precision=hp) + p["be3"]
    z = h * p["z_std"] + p["z_mean"]
    # decoder (input_stats=z_stats, output_raw=True)
    zs = (z - p["z_mean"]) / p["z_std"]
    hd = jnp.dot(jnp.concatenate([zs, eps_x], -1), p["Wd0"], precision=hp) + p["bd0"]
    hd = jnp.dot(hd, p["Wd1"], precision=hp) + p["bd1"]
    hd = resblock(hd, p["gamma_d"], p["beta_d"], p["Wrd"], p["brd"])
    xt = jnp.dot(hd, p["Wd3"], precision=hp) + p["bd3"]
    xt = xt * p["x_std"] + p["x_mean"]
    return z, xt


# ----------------------------- demo --------------------------------------------------
if __name__ == "__main__":
    key = jax.random.PRNGKey(0)
    k_x, k_ez, k_ex, k_p = jax.random.split(key, 4)

    B = 8                                                   # small; single tile -> exact BN stats
    p = init_raw_params(k_p)
    x = p["x_mean"] + p["x_std"] * jax.random.normal(k_x, (B, X_DIM), jnp.float32)  # raw-space x
    # TODO(synk): eps could be drawn in-kernel (pltpu.prng_seed + pltpu.stateful_normal) to drop
    # this HBM stream at large batch; kept host-side here so the stochastic draws are reproducible.
    eps_z = jax.random.normal(k_ez, (B, Z_DIM), jnp.float32)
    eps_x = jax.random.normal(k_ex, (B, X_DIM), jnp.float32)

    wslab, vslab = pack_params(p)
    z_tilde, x_tilde = autoencoder_forward(x, eps_z, eps_x, wslab, vslab)
    jax.block_until_ready((z_tilde, x_tilde))
    assert z_tilde.shape == (B, Z_DIM) and x_tilde.shape == (B, X_DIM)

    # sanity check the host-side fusions against the unfused reference forward
    z_ref, x_ref = reference_forward(x, eps_z, eps_x, p)
    ok = bool(jnp.allclose(z_tilde, z_ref, rtol=2e-2, atol=2e-2)) and \
         bool(jnp.allclose(x_tilde, x_ref, rtol=2e-2, atol=2e-2))
    assert ok, "kernel deviates from reference forward"

    # TODO(synk): inv_masses / io_residual branches are configuration-off here (inv_masses=None,
    # io_residual=False); they are plain elementwise + sqrt post-processing if ever needed.
    print("KERNEL_OK")
</pallas_src>

<mosaic_0001>
module attributes {stable_mosaic.version = 11 : i64} {
  func.func @autoencoder_kernel(%arg0: i32, %arg1: memref<8x40xf32, #tpu.memory_space<vmem>>, %arg2: memref<264x128xf32, #tpu.memory_space<vmem>>, %arg3: memref<8x128xf32, #tpu.memory_space<vmem>>, %arg4: memref<8x128xf32, #tpu.memory_space<vmem>>) attributes {dimension_semantics = [#tpu.dimension_semantics<parallel>], iteration_bounds = array<i64: 1>, scalar_prefetch = 0 : i64, scratch_operands = 0 : i64, tpu.core_type = #tpu.core_type<tc>, window_params = [{transform_indices = @transform_0, window_bounds = array<i64: 8, 40>}, {pipeline_mode = #tpu.pipeline_mode<synchronous>, transform_indices = @transform_1, window_bounds = array<i64: 264, 128>}, {pipeline_mode = #tpu.pipeline_mode<synchronous>, transform_indices = @transform_2, window_bounds = array<i64: 8, 128>}, {transform_indices = @transform_3, window_bounds = array<i64: 8, 128>}]} {
    %c0 = arith.constant 0 : index
    %c0_0 = arith.constant 0 : index
    %0 = vector.load %arg1[%c0, %c0_0] : memref<8x40xf32, #tpu.memory_space<vmem>>, vector<8x40xf32>
    %c0_1 = arith.constant 0 : index
    %c0_2 = arith.constant 0 : index
    %1 = vector.load %arg2[%c0_1, %c0_2] : memref<264x128xf32, #tpu.memory_space<vmem>>, vector<40x32xf32>
    %cst = arith.constant dense<0.000000e+00> : vector<8x32xf32>
    %2 = tpu.matmul %0, %1, %cst {dimension_numbers = #tpu.dot_dimension_numbers<[1], [0], [0], [1], [0, 0, 1, 1], [], []>} : vector<8x40xf32>, vector<40x32xf32>, vector<8x32xf32> -> vector<8x32xf32>
    %c0_3 = arith.constant 0 : index
    %c0_4 = arith.constant 0 : index
    %3 = vector.load %arg3[%c0_3, %c0_4] : memref<8x128xf32, #tpu.memory_space<vmem>>, vector<1x32xf32>
    %4 = vector.broadcast %3 : vector<1x32xf32> to vector<8x32xf32>
    %5 = arith.addf %2, %4 : vector<8x32xf32>
    %c0_5 = arith.constant 0 : index
    %c64 = arith.constant 64 : index
    %6 = vector.load %arg3[%c0_5, %c64] : memref<8x128xf32, #tpu.memory_space<vmem>>, vector<1x32xf32>
    %c0_6 = arith.constant 0 : index
    %c96 = arith.constant 96 : index
    %7 = vector.load %arg3[%c0_6, %c96] : memref<8x128xf32, #tpu.memory_space<vmem>>, vector<1x32xf32>
    %c40 = arith.constant 40 : index
    %c0_7 = arith.constant 0 : index
    %8 = vector.load %arg2[%c40, %c0_7] : memref<264x128xf32, #tpu.memory_space<vmem>>, vector<32x32xf32>
    %c1 = arith.constant 1 : index
    %c0_8 = arith.constant 0 : index
    %9 = vector.load %arg3[%c1, %c0_8] : memref<8x128xf32, #tpu.memory_space<vmem>>, vector<1x32xf32>
    %cst_9 = arith.constant dense<0.000000e+00> : vector<32xf32>
    %10 = vector.multi_reduction <add>, %5, %cst_9 [0] : vector<8x32xf32> to vector<32xf32>
    %11 = vector.shape_cast %10 : vector<32xf32> to vector<1x32xf32>
    %cst_10 = arith.constant 8.000000e+00 : f32
    %12 = vector.broadcast %cst_10 : f32 to vector<1x32xf32>
    %13 = arith.divf %11, %12 : vector<1x32xf32>
    %14 = vector.broadcast %13 : vector<1x32xf32> to vector<8x32xf32>
    %15 = arith.subf %5, %14 : vector<8x32xf32>
    %16 = arith.mulf %15, %15 : vector<8x32xf32>
    %cst_11 = arith.constant dense<0.000000e+00> : vector<32xf32>
    %17 = vector.multi_reduction <add>, %16, %cst_11 [0] : vector<8x32xf32> to vector<32xf32>
    %18 = vector.shape_cast %17 : vector<32xf32> to vector<1x32xf32>
    %cst_12 = arith.constant 8.000000e+00 : f32
    %19 = vector.broadcast %cst_12 : f32 to vector<1x32xf32>
    %20 = arith.divf %18, %19 : vector<1x32xf32>
    %cst_13 = arith.constant 9.99999974E-6 : f32
    %21 = vector.broadcast %cst_13 : f32 to vector<1x32xf32>
    %22 = arith.addf %20, %21 : vector<1x32xf32>
    %23 = math.rsqrt %22 : vector<1x32xf32>
    %24 = arith.mulf %23, %6 : vector<1x32xf32>
    %25 = arith.mulf %13, %24 : vector<1x32xf32>
    %26 = arith.subf %7, %25 : vector<1x32xf32>
    %27 = vector.broadcast %24 : vector<1x32xf32> to vector<8x32xf32>
    %28 = arith.mulf %5, %27 : vector<8x32xf32>
    %29 = vector.broadcast %26 : vector<1x32xf32> to vector<8x32xf32>
    %30 = arith.addf %28, %29 : vector<8x32xf32>
    %cst_14 = arith.constant 0.000000e+00 : f32
    %31 = vector.broadcast %cst_14 : f32 to vector<8x32xf32>
    %32 = arith.maximumf %30, %31 : vector<8x32xf32>
    %cst_15 = arith.constant dense<0.000000e+00> : vector<8x32xf32>
    %33 = tpu.matmul %32, %8, %cst_15 {dimension_numbers = #tpu.dot_dimension_numbers<[1], [0], [0], [1], [0, 0, 1, 1], [], []>} : vector<8x32xf32>, vector<32x32xf32>, vector<8x32xf32> -> vector<8x32xf32>
    %34 = vector.broadcast %9 : vector<1x32xf32> to vector<8x32xf32>
    %35 = arith.addf %33, %34 : vector<8x32xf32>
    %36 = arith.addf %35, %5 : vector<8x32xf32>
    %c72 = arith.constant 72 : index
    %c0_16 = arith.constant 0 : index
    %37 = vector.load %arg2[%c72, %c0_16] : memref<264x128xf32, #tpu.memory_space<vmem>>, vector<32x128xf32>
    %cst_17 = arith.constant dense<0.000000e+00> : vector<8x128xf32>
    %38 = tpu.matmul %36, %37, %cst_17 {dimension_numbers = #tpu.dot_dimension_numbers<[1], [0], [0], [1], [0, 0, 1, 1], [], []>} : vector<8x32xf32>, vector<32x128xf32>, vector<8x128xf32> -> vector<8x128xf32>
    %c2 = arith.constant 2 : index
    %c0_18 = arith.constant 0 : index
    %39 = vector.load %arg3[%c2, %c0_18] : memref<8x128xf32, #tpu.memory_space<vmem>>, vector<1x128xf32>
    %40 = vector.broadcast %39 : vector<1x128xf32> to vector<8x128xf32>
    %41 = arith.addf %38, %40 : vector<8x128xf32>
    %c136 = arith.constant 136 : index
    %c0_19 = arith.constant 0 : index
    %42 = vector.load %arg2[%c136, %c0_19] : memref<264x128xf32, #tpu.memory_space<vmem>>, vector<128x32xf32>
    %cst_20 = arith.constant dense<0.000000e+00> : vector<8x32xf32>
    %43 = tpu.matmul %41, %42, %cst_20 {dimension_numbers = #tpu.dot_dimension_numbers<[1], [0], [0], [1], [0, 0, 1, 1], [], []>} : vector<8x128xf32>, vector<128x32xf32>, vector<8x32xf32> -> vector<8x32xf32>
    %c0_21 = arith.constant 0 : index
    %c32 = arith.constant 32 : index
    %44 = vector.load %arg2[%c0_21, %c32] : memref<264x128xf32, #tpu.memory_space<vmem>>, vector<40x32xf32>
    %cst_22 = arith.constant dense<0.000000e+00> : vector<8x32xf32>
    %45 = tpu.matmul %0, %44, %cst_22 {dimension_numbers = #tpu.dot_dimension_numbers<[1], [0], [0], [1], [0, 0, 1, 1], [], []>} : vector<8x40xf32>, vector<40x32xf32>, vector<8x32xf32> -> vector<8x32xf32>
    %46 = arith.addf %43, %45 : vector<8x32xf32>
    %c0_23 = arith.constant 0 : index
    %c32_24 = arith.constant 32 : index
    %47 = vector.load %arg3[%c0_23, %c32_24] : memref<8x128xf32, #tpu.memory_space<vmem>>, vector<1x32xf32>
    %48 = vector.broadcast %47 : vector<1x32xf32> to vector<8x32xf32>
    %49 = arith.addf %46, %48 : vector<8x32xf32>
    %c1_25 = arith.constant 1 : index
    %c64_26 = arith.constant 64 : index
    %50 = vector.load %arg3[%c1_25, %c64_26] : memref<8x128xf32, #tpu.memory_space<vmem>>, vector<1x32xf32>
    %c1_27 = arith.constant 1 : index
    %c96_28 = arith.constant 96 : index
    %51 = vector.load %arg3[%c1_27, %c96_28] : memref<8x128xf32, #tpu.memory_space<vmem>>, vector<1x32xf32>
    %c40_29 = arith.constant 40 : index
    %c32_30 = arith.constant 32 : index
    %52 = vector.load %arg2[%c40_29, %c32_30] : memref<264x128xf32, #tpu.memory_space<vmem>>, vector<32x32xf32>
    %c1_31 = arith.constant 1 : index
    %c32_32 = arith.constant 32 : index
    %53 = vector.load %arg3[%c1_31, %c32_32] : memref<8x128xf32, #tpu.memory_space<vmem>>, vector<1x32xf32>
    %cst_33 = arith.constant dense<0.000000e+00> : vector<32xf32>
    %54 = vector.multi_reduction <add>, %49, %cst_33 [0] : vector<8x32xf32> to vector<32xf32>
    %55 = vector.shape_cast %54 : vector<32xf32> to vector<1x32xf32>
    %cst_34 = arith.constant 8.000000e+00 : f32
    %56 = vector.broadcast %cst_34 : f32 to vector<1x32xf32>
    %57 = arith.divf %55, %56 : vector<1x32xf32>
    %58 = vector.broadcast %57 : vector<1x32xf32> to vector<8x32xf32>
    %59 = arith.subf %49, %58 : vector<8x32xf32>
    %60 = arith.mulf %59, %59 : vector<8x32xf32>
    %cst_35 = arith.constant dense<0.000000e+00> : vector<32xf32>
    %61 = vector.multi_reduction <add>, %60, %cst_35 [0] : vector<8x32xf32> to vector<32xf32>
    %62 = vector.shape_cast %61 : vector<32xf32> to vector<1x32xf32>
    %cst_36 = arith.constant 8.000000e+00 : f32
    %63 = vector.broadcast %cst_36 : f32 to vector<1x32xf32>
    %64 = arith.divf %62, %63 : vector<1x32xf32>
    %cst_37 = arith.constant 9.99999974E-6 : f32
    %65 = vector.broadcast %cst_37 : f32 to vector<1x32xf32>
    %66 = arith.addf %64, %65 : vector<1x32xf32>
    %67 = math.rsqrt %66 : vector<1x32xf32>
    %68 = arith.mulf %67, %50 : vector<1x32xf32>
    %69 = arith.mulf %57, %68 : vector<1x32xf32>
    %70 = arith.subf %51, %69 : vector<1x32xf32>
    %71 = vector.broadcast %68 : vector<1x32xf32> to vector<8x32xf32>
    %72 = arith.mulf %49, %71 : vector<8x32xf32>
    %73 = vector.broadcast %70 : vector<1x32xf32> to vector<8x32xf32>
    %74 = arith.addf %72, %73 : vector<8x32xf32>
    %cst_38 = arith.constant 0.000000e+00 : f32
    %75 = vector.broadcast %cst_38 : f32 to vector<8x32xf32>
    %76 = arith.maximumf %74, %75 : vector<8x32xf32>
    %cst_39 = arith.constant dense<0.000000e+00> : vector<8x32xf32>
    %77 = tpu.matmul %76, %52, %cst_39 {dimension_numbers = #tpu.dot_dimension_numbers<[1], [0], [0], [1], [0, 0, 1, 1], [], []>} : vector<8x32xf32>, vector<32x32xf32>, vector<8x32xf32> -> vector<8x32xf32>
    %78 = vector.broadcast %53 : vector<1x32xf32> to vector<8x32xf32>
    %79 = arith.addf %77, %78 : vector<8x32xf32>
    %80 = arith.addf %79, %49 : vector<8x32xf32>
    %c104 = arith.constant 104 : index
    %c0_40 = arith.constant 0 : index
    %81 = vector.load %arg2[%c104, %c0_40] : memref<264x128xf32, #tpu.memory_space<vmem>>, vector<32x128xf32>
    %cst_41 = arith.constant dense<0.000000e+00> : vector<8x128xf32>
    %82 = tpu.matmul %80, %81, %cst_41 {dimension_numbers = #tpu.dot_dimension_numbers<[1], [0], [0], [1], [0, 0, 1, 1], [], []>} : vector<8x32xf32>, vector<32x128xf32>, vector<8x128xf32> -> vector<8x128xf32>
    %c3 = arith.constant 3 : index
    %c0_42 = arith.constant 0 : index
    %83 = vector.load %arg3[%c3, %c0_42] : memref<8x128xf32, #tpu.memory_space<vmem>>, vector<1x128xf32>
    %84 = vector.broadcast %83 : vector<1x128xf32> to vector<8x128xf32>
    %85 = arith.addf %82, %84 : vector<8x128xf32>
    %86 = arith.addf %41, %85 : vector<8x128xf32>
    %c0_43 = arith.constant 0 : index
    %c0_44 = arith.constant 0 : index
    %87 = vector.load %arg4[%c0_43, %c0_44] : memref<8x128xf32, #tpu.memory_space<vmem>>, vector<8x128xf32>
    tpu.vector_store %arg4[%c0_43, %c0_44], %86 {strides = array<i32>} : memref<8x128xf32, #tpu.memory_space<vmem>>, vector<8x128xf32>,
    return
  }
  func.func @transform_0(%arg0: i32) -> (i32, i32) {
    %c0_i32 = arith.constant 0 : i32
    %c0_i32_0 = arith.constant 0 : i32
    return %arg0, %c0_i32 : i32, i32
  }
  func.func @transform_1(%arg0: i32) -> (i32, i32) {
    %c0_i32 = arith.constant 0 : i32
    %c0_i32_0 = arith.constant 0 : i32
    %c0_i32_1 = arith.constant 0 : i32
    return %c0_i32, %c0_i32_0 : i32, i32
  }
  func.func @transform_2(%arg0: i32) -> (i32, i32) {
    %c0_i32 = arith.constant 0 : i32
    %c0_i32_0 = arith.constant 0 : i32
    %c0_i32_1 = arith.constant 0 : i32
    return %c0_i32, %c0_i32_0 : i32, i32
  }
  func.func @transform_3(%arg0: i32) -> (i32, i32) {
    %c0_i32 = arith.constant 0 : i32
    %c0_i32_0 = arith.constant 0 : i32
    return %arg0, %c0_i32 : i32, i32
  }
}

</mosaic_0001>

<bundles_post_ra>
// kernel: tpu_custom_call.1
= control target key start
LH: loop header
LB: loop body
LE: loop exit
PB: predicated region body
PF: predicated region fallthrough
CT: control target
= control target key end

     0   :  { %8 = vsyncpa [#allocation3], 0  ;;  %s1343_s0 = inlined_call_operand.hbm [shape: f32[8,40], index: 0, kind: input, shape index: {}]   ;;  %s1344_s1 = inlined_call_operand.hbm [shape: f32[264,128], index: 1, kind: input, shape index: {}]   ;;  %s1345_s2 = inlined_call_operand.hbm [shape: f32[8,128], index: 2, kind: input, shape index: {}]   ;;  %s1346_s3 = inlined_call_operand.hbm [shape: f32[8,128], index: 3, kind: output, shape index: {}]  }
   0x1   :  { %9 = vsyncpa [#allocation6], 0 }
   0x2   :  { %10 = vsyncpa [#allocation4], 0  ;;  %s1123_s12 = smov [#allocation5]   ;;  %s1029_s16 = scalar_lea.hbm %s1344_s1, 4224 }
   0x3   :  { %s26_s13 = sshll.u32 %s1123_s12, 4  ;;  %p1030_p0 = scmp.ne.s32.totalorder %s1344_s1, %s1029_s16  ;;  %s27_s13 = int_to_ptr.vmem [resolvable:$true] %s26_s13 }
   0x4   :  { %p1033_p1 = scmp.lt.u32.totalorder %s1029_s16, %s1344_s1 }
   0x6   :  { %p1035_p2 = pnand %p1033_p1, %p1030_p0 }
   0x8   :  { %1038 = shalt.err (!%p1035_p2)
}
   0x9   :  { %s1039_s21 = scalar_lea.vmem %s27_s13, 4224  ;;  %p1044_p4 = scmp.lt.s32.totalorder %s27_s13, %s27_s13 }
   0xa   :  { %p1040_p3 = scmp.ne.s32.totalorder %s27_s13, %s1039_s21  ;;  %p1045_p5 = scmp.lt.s32.totalorder %s1039_s21, %s1039_s21 }
   0xc   :  { %p1046_p6 = por %p1045_p5, %p1044_p4 }
   0xe   :  { %p1047_p7 = pnand %p1046_p6, %p1040_p3 }
  0x10   :  { %1050 = shalt.err (!%p1047_p7)
}
  0x11   :  { %s1124_s22 = smov 128   ;;  %s1125_s23 = smov 8  }
  0x12   :  { %32 = dma.hbm_to_vmem [thread:$0]  %s1344_s1, 4224, %s27_s13, [#allocation6], %s1124_s22, %s1124_s22, %s1125_s23  }
  0x13   :  { %s1126_s26 = smov [#allocation2]   ;;  %s1127_s28 = smov [#allocation7]  }
  0x14   :  { %s17_s27 = sshll.u32 %s1126_s26, 4  ;;  %s39_s29 = sshll.u32 %s1127_s28, 4  ;;  %s18_s27 = int_to_ptr.vmem [resolvable:$true] %s17_s27  ;;  %s40_s29 = int_to_ptr.vmem [resolvable:$true] %s39_s29 }
  0x15   :  { %s1051_s5 = scalar_lea.hbm %s1343_s0, 128 }
  0x16   :  { %p1052_p8 = scmp.ne.s32.totalorder %s1343_s0, %s1051_s5  ;;  %p1055_p9 = scmp.lt.u32.totalorder %s1051_s5, %s1343_s0 }
  0x18   :  { %p1057_p10 = pnand %p1055_p9, %p1052_p8 }
  0x1a   :  { %1060 = shalt.err (!%p1057_p10)
}
  0x1b   :  { %s1061_s1 = scalar_lea.vmem %s18_s27, 128  ;;  %p1066_p12 = scmp.lt.s32.totalorder %s18_s27, %s18_s27 }
  0x1c   :  { %p1062_p11 = scmp.ne.s32.totalorder %s18_s27, %s1061_s1  ;;  %p1067_p13 = scmp.lt.s32.totalorder %s1061_s1, %s1061_s1 }
  0x1e   :  { %p1068_p0 = por %p1067_p13, %p1066_p12 }
  0x20   :  { %p1069_p1 = pnand %p1068_p0, %p1062_p11 }
  0x22   :  { %1072 = shalt.err (!%p1069_p1)
}
  0x23   :  { %20 = dma.hbm_to_vmem [thread:$0]  %s1343_s0, 128, %s18_s27, [#allocation3]  }
  0x24   :  { %s1073_s14 = scalar_lea.hbm %s1345_s2, 128 }
  0x25   :  { %p1074_p2 = scmp.ne.s32.totalorder %s1345_s2, %s1073_s14  ;;  %p1077_p3 = scmp.lt.u32.totalorder %s1073_s14, %s1345_s2 }
  0x27   :  { %p1079_p4 = pnand %p1077_p3, %p1074_p2 }
  0x29   :  { %1082 = shalt.err (!%p1079_p4)
}
  0x2a   :  { %s1083_s19 = scalar_lea.vmem %s40_s29, 128  ;;  %p1088_p6 = scmp.lt.s32.totalorder %s40_s29, %s40_s29 }
  0x2b   :  { %p1084_p5 = scmp.ne.s32.totalorder %s40_s29, %s1083_s19  ;;  %p1089_p7 = scmp.lt.s32.totalorder %s1083_s19, %s1083_s19 }
  0x2d   :  { %p1090_p8 = por %p1089_p7, %p1088_p6 }
  0x2f   :  { %p1091_p9 = pnand %p1090_p8, %p1084_p5 }
  0x31   :  { %1094 = shalt.err (!%p1091_p9)
}
  0x32   :  { %42 = dma.hbm_to_vmem [thread:$0]  %s1345_s2, 128, %s40_s29, [#allocation6]  }
  0x33   :  { %1117 = dma.done.wait [#allocation3], 128  }
  0x34   :  { %1118 = vsyncadd [#allocation3], 4294967168 }
  0x35   :  { %1119 = dma.done.wait [#allocation6], 4352  }
  0x36   :  { %1120 = vsyncadd [#allocation6], 4294962944  ;;  %v1128_v0 = vmov 0.0|0.0   ;;  %vm1129_vm0 = vmmov 0   ;;  %v1130_v1 = vmov 0.0   ;;  %v1197_v2 = vld [vmem:[#allocation5] sm:$0xff]  ;;  %v59_v12 = vlaneseq }
  0x37   :  { %933 = vmatprep.subr.bf16.mxu0 %v1128_v0  ;;  %838 = vmatprep.mubr.msk.f32.mxu0 %vm1129_vm0, %v1130_v1  ;;  %v1199_v3 = vld [vmem:[#allocation5 + $0x8] sm:$0xff]  ;;  %v1201_v4 = vld [vmem:[#allocation5 + $0x10] sm:$0xff]  ;;  %v1207_v7 = vld [vmem:[#allocation5 + $0x18] sm:$0xff]  ;;  %s1131_s2 = smov 64   ;;  %vm63_vm1 = vcmask 326656   ;;  %vm142_vm2 = vcmask 261120  }
  0x38   :  { %945 = vmatprep.subr.bf16.mxu1 %v1128_v0  ;;  %860 = vmatprep.mubr.msk.f32.mxu1 %vm1129_vm0, %v1130_v1  ;;  %v1005_v5 = vpack.i.bf16 %v1199_v3, %v1197_v2  ;;  %v934_v6 = vpack.c.bf16 %v1199_v3, %v1197_v2  ;;  %v1209_v8 = vld [vmem:[#allocation7] sm:$0x1]  ;;  %v937_v9 = vpack.c.bf16 %v1207_v7, %v1201_v4  ;;  %v57_v10 = vld [vmem:[#allocation5 + $0x20] sm:$0xff]  ;;  %v1217_v11 = vld [vmem:[#allocation2] sm:$0xff]  ;;  %v60_v13 = vshrl.u32 %v59_v12, 7  ;;  %s1132_s21 = smov 96  }
  0x39   :  { %165 = vrot.lane.b32.xlu0 %v1209_v8, %s1131_s2  ;;  %v1237_v38 = vld [vmem:[#allocation5 + $0x28] sm:$0xff]  ;;  %v1239_v39 = vld [vmem:[#allocation5 + $0x30] sm:$0xff]  ;;  %v1245_v45 = vld [vmem:[#allocation5 + $0x38] sm:$0xff]  ;;  %s1133_s22 = smov 32   ;;  %v1010_v63 = vpack.i.bf16 %v1207_v7, %v1201_v4  ;;  %s1134_s23 = smov [#allocation8]  }
  0x3a   :  { %935 = vmatpush3.bf16.msra.mxu0 %v934_v6  ;;  %v1224_v14 = vsub.s32 0, %v60_v13  ;;  %v940_v40 = vpack.c.bf16 %v1239_v39, %v1237_v38  ;;  %v1247_v46 = vld [vmem:[#allocation5 + $0x40] sm:$0xff]  ;;  %v268_v48 = vld [vmem:[#allocation5 + $0x48] sm:$0xff]  ;;  %v269_v49 = vld [vmem:[#allocation5 + $0x50] sm:$0xff]  ;;  %s761_s24 = sshll.u32 %s1134_s23, 4  ;;  %s762_s24 = int_to_ptr.vmem [resolvable:$true] %s761_s24 }
  0x3b   :  { %936 = vmatprep.subr.bf16.mxu0 %v1128_v0  ;;  %v943_v47 = vpack.c.bf16 %v1247_v46, %v1245_v45  ;;  %v946_v50 = vpack.c.bf16 %v269_v49, %v268_v48  ;;  %v1261_v54 = vld [vmem:[#allocation7 + $0x1] sm:$0x1]  ;;  %v270_v60 = vld [vmem:[#allocation5 + $0x58] sm:$0xff]  ;;  %v271_v61 = vld [vmem:[#allocation5 + $0x60] sm:$0xff]  ;;  %s1095_s25 = scalar_lea.vmem %s762_s24, 128  ;;  %p1100_p11 = scmp.lt.s32.totalorder %s762_s24, %s762_s24 }
  0x3c   :  { %v1228_v15 = vrot.slane %v1209_v8, %v1224_v14  ;;  %v949_v62 = vpack.c.bf16 %v271_v61, %v270_v60  ;;  %v1279_v13 = vrot.slane %v1261_v54, %v1224_v14  ;;  %v350_v4 = vld [vmem:[#allocation5 + $0x88] sm:$0xff]  ;;  %v351_v7 = vld [vmem:[#allocation5 + $0x90] sm:$0xff]  ;;  %p1096_p10 = scmp.ne.s32.totalorder %s762_s24, %s1095_s25  ;;  %p1101_p12 = scmp.lt.s32.totalorder %s1095_s25, %s1095_s25 }
  0x3d   :  { %947 = vmatpush3.bf16.msra.mxu1 %v946_v50 }
  0x3e   :  { %938 = vmatpush3.bf16.msra.mxu0 %v937_v9  ;;  %948 = vmatprep.subr.bf16.mxu1 %v1128_v0  ;;  %p1102_p13 = por %p1101_p12, %p1100_p11 }
  0x3f   :  { %836 = vmatprep.subr.mxu0 %v1130_v1 }
  0x40   :  { %p1103_p0 = pnand %p1102_p13, %p1096_p10 }
  0x41   :  { %950 = vmatpush3.bf16.msra.mxu1 %v949_v62 }
  0x42   :  { %837 = vmatpush3.msra.mxu0 %v57_v10  ;;  %957 = vmatprep.subr.bf16.mxu1 %v1128_v0 }
  0x43   :  { %839 = vmatmul.mubr.msk.f32.vlgmr.msra.gmra.mrb[0].mxu0 %vm63_vm1, %v1217_v11  ;;  %939 = vmatprep.subr.bf16.mxu0 %v1128_v0 }
  0x44   :  { %849 = vmatprep.mubr.msk.f32.mxu0 %vm1129_vm0, %v1130_v1  ;;  %941 = vmatpush3.bf16.msra.mxu0 %v940_v40  ;;  %v364_v40 = vld [vmem:[#allocation5 + $0xf8] sm:$0xff] }
  0x45   :  { %942 = vmatprep.subr.bf16.mxu0 %v1128_v0 }
  0x48   :  { %944 = vmatpush3.bf16.msra.mxu0 %v943_v47 }
  0x49   :  { %951 = vmatprep.subr.bf16.mxu0 %v1128_v0 }
  0xab   :  { %v166_v41 = vpop.permute.xlu0 %165 }
 0x116   :  { %v133_v16 = vpop.f32.mrb[0].mxu0 }
 0x117   :  { %v1231_v17 = vadd.f32 %v133_v16, %v1228_v15  ;;  %v840_v18 = vpop.f32.mrb[1].mxu0 }
 0x119   :  { %v143_v19 = vsel %vm142_vm2, %v1231_v17, 0.0 }
 0x11a   :  { %v144_v20 = vrot.slane %v143_v19, 4 }
 0x11c   :  { %v145_v21 = vadd.f32 %v144_v20, %v143_v19  ;;  %v958_v20 = vpack.c.bf16 %v351_v7, %v350_v4 }
 0x11e   :  { %v146_v22 = vrot.slane %v145_v21, 2 }
 0x120   :  { %v147_v23 = vadd.f32 %v146_v22, %v145_v21  ;;  %v352_v22 = vld [vmem:[#allocation5 + $0x98] sm:$0xff] }
 0x122   :  { %v148_v24 = vrot.slane %v147_v23, 1 }
 0x124   :  { %v149_v25 = vadd.f32 %v148_v24, %v147_v23  ;;  %v353_v23 = vld [vmem:[#allocation5 + $0xa0] sm:$0xff] }
 0x125   :  { %v961_v24 = vpack.c.bf16 %v353_v23, %v352_v22 }
 0x126   :  { %v151_v26 = vmul.f32 0.125, %v149_v25  ;;  %v355_v25 = vld [vmem:[#allocation5 + $0xb0] sm:$0xff] }
 0x128   :  { %v152_v27 = vsub.f32 %v1231_v17, %v151_v26 }
 0x12a   :  { %v153_v28 = vmul.f32 %v152_v27, %v152_v27  ;;  %v357_v27 = vld [vmem:[#allocation5 + $0xc0] sm:$0xff] }
 0x12c   :  { %v154_v29 = vsel %vm142_vm2, %v153_v28, 0.0 }
 0x12d   :  { %v155_v30 = vrot.slane %v154_v29, 4 }
 0x12f   :  { %v156_v31 = vadd.f32 %v155_v30, %v154_v29  ;;  %v358_v29 = vld [vmem:[#allocation5 + $0xc8] sm:$0xff]  ;;  %v359_v30 = vld [vmem:[#allocation5 + $0xd0] sm:$0xff] }
 0x131   :  { %v157_v32 = vrot.slane %v156_v31, 2 }
 0x133   :  { %v158_v33 = vadd.f32 %v157_v32, %v156_v31  ;;  %v970_v31 = vpack.c.bf16 %v359_v30, %v358_v29  ;;  %v360_v32 = vld [vmem:[#allocation5 + $0xd8] sm:$0xff] }
 0x135   :  { %v159_v34 = vrot.slane %v158_v33, 1 }
 0x137   :  { %v160_v35 = vadd.f32 %v159_v34, %v158_v33  ;;  %v361_v33 = vld [vmem:[#allocation5 + $0xe0] sm:$0xff] }
 0x138   :  { %v973_v34 = vpack.c.bf16 %v361_v33, %v360_v32 }
 0x139   :  { %v161_v36 = vmul.f32 0.125, %v160_v35  ;;  %v362_v35 = vld [vmem:[#allocation5 + $0xe8] sm:$0xff] }
 0x13b   :  { %v162_v37 = vadd.f32 1e-05, %v161_v36  ;;  %v363_v36 = vld [vmem:[#allocation5 + $0xf0] sm:$0xff] }
 0x13d   :  { %1025 = vrsqrt.f32 %v162_v37  ;;  %v976_v37 = vpack.c.bf16 %v363_v36, %v362_v35  ;;  %v673_v35 = vld [vmem:[#allocation5 + $0x78] sm:$0xff]  ;;  %v674_v36 = vld [vmem:[#allocation5 + $0x80] sm:$0xff] }
 0x147   :  { %v1026_v42 = vpop.eup %1025 }
 0x148   :  { %v168_v43 = vmul.f32 %v1026_v42, %v166_v41  ;;  %v365_v41 = vld [vmem:[#allocation5 + $0x100] sm:$0xff] }
 0x149   :  { %v979_v42 = vpack.c.bf16 %v365_v41, %v364_v40 }
 0x14a   :  { %v169_v44 = vmul.f32 %v168_v43, %v151_v26  ;;  %v178_v55 = vrot.slane %v168_v43, %v1224_v14  ;;  %v773_v43 = vld [vmem:[#allocation7 + $0x2] ss:$0 sm:$0xff] }
 0x14c   :  { %171 = vrot.lane.b32.xlu0 %v169_v44, %s1132_s21  ;;  %v179_v56 = vmul.f32 %v178_v55, %v1231_v17 }
 0x150   :  { %1011 = vrot.lane.b32.xlu0 %v1010_v63, %s1132_s21 }
 0x154   :  { %527 = vrot.lane.b32.xlu0 %v1228_v15, %s1132_s21 }
 0x1be   :  { %v172_v51 = vpop.permute.xlu0 %171 }
 0x1bf   :  { %v174_v52 = vsub.f32 %v1209_v8, %v172_v51  ;;  %v1015_v51 = vpack.i.bf16 %v1239_v39, %v1237_v38 }
 0x1c1   :  { %v183_v53 = vrot.slane %v174_v52, %v1224_v14 }
 0x1c2   :  { %v1012_v8 = vpop.permute.xlu0 %1011 }
 0x1c3   :  { %185 = vrot.lane.b32.xlu1 %v183_v53, %s1133_s22  ;;  %v1014_v9 = vunpack.i.h.bf16 %v1012_v8 }
 0x1c6   :  { %v528_v53 = vpop.permute.xlu0 %527 }
 0x1c7   :  { %1006 = vrot.lane.b32.xlu1 %v1005_v5, %s1132_s21 }
 0x1cb   :  { %379 = vrot.lane.b32.xlu1 %v57_v10, %s1132_s21  ;;  %v1013_v10 = vunpack.i.l.bf16 %v1012_v8 }
 0x1cd   :  { %v955_v12 = vpack.c.bf16 %v1014_v9, %v1013_v10 }
 0x1cf   :  { %552 = vrot.lane.b32.xlu1 %v1261_v54, %s1131_s2 }
 0x1d3   :  { %1016 = vrot.lane.b32.xlu1 %v1015_v51, %s1132_s21 }
 0x235   :  { %v186_v57 = vpop.permute.xlu1 %185 }
 0x236   :  { %v188_v58 = vadd.f32 %v186_v57, %v179_v56 }
 0x238   :  { %v189_v59 = vmax.f32 %v188_v58, 0.0 }
 0x239   :  { %v1007_v2 = vpop.permute.xlu1 %1006 }
 0x23a   :  { %850 = vmatmul.mubr.msk.f32.vlgmr.msra.gmra.mrb[2].mxu0 %vm142_vm2, %v189_v59  ;;  %v1009_v3 = vunpack.i.h.bf16 %v1007_v2  ;;  %v1008_v5 = vunpack.i.l.bf16 %v1007_v2 }
 0x23b   :  { %873 = vmatprep.mubr.msk.f32.mxu0 %vm1129_vm0, %v1130_v1 }
 0x23c   :  { %v952_v6 = vpack.c.bf16 %v1009_v3, %v1008_v5 }
 0x23d   :  { %v380_v16 = vpop.permute.xlu1 %379 }
 0x23e   :  { %953 = vmatpush3.bf16.msra.mxu0 %v952_v6 }
 0x23f   :  { %954 = vmatprep.subr.bf16.mxu0 %v1128_v0 }
 0x242   :  { %956 = vmatpush3.bf16.msra.mxu0 %v955_v12 }
 0x243   :  { %871 = vmatprep.subr.mxu0 %v1130_v1 }
 0x246   :  { %872 = vmatpush3.msra.mxu0 %v380_v16 }
 0x247   :  { %874 = vmatmul.mubr.msk.f32.vlgmr.msra.gmra.mrb[4].mxu0 %vm63_vm1, %v1217_v11  ;;  %981 = vmatprep.subr.bf16.mxu0 %v1128_v0  ;;  %v356_v11 = vld [vmem:[#allocation5 + $0xb8] sm:$0xff] }
 0x248   :  { %919 = vmatprep.mubr.msk.f32.mxu0 %vm1129_vm0, %v1130_v1  ;;  %v967_v28 = vpack.c.bf16 %v357_v27, %v356_v11 }
 0x30d   :  { %v263_v15 = vpop.f32.mrb[2].mxu0 }
 0x30e   :  { %v264_v18 = vadd.f32 %v263_v15, %v1279_v13  ;;  %v851_v19 = vpop.f32.mrb[3].mxu0  ;;  %v553_v15 = vpop.permute.xlu1 %552 }
 0x310   :  { %v267_v21 = vadd.f32 %v264_v18, %v1231_v17  ;;  %v354_v17 = vld [vmem:[#allocation5 + $0xa8] sm:$0xff] }
 0x311   :  { %v964_v26 = vpack.c.bf16 %v355_v25, %v354_v17  ;;  %v1020_v17 = vpack.i.bf16 %v1247_v46, %v1245_v45 }
 0x312   :  { %861 = vmatmul.mubr.msk.f32.vlgmr.msra.gmra.mrb[0].mxu1 %vm142_vm2, %v267_v21  ;;  %v1017_v18 = vpop.permute.xlu1 %1016 }
 0x313   :  { %959 = vmatpush3.bf16.msra.mxu1 %v958_v20  ;;  %908 = vmatprep.mubr.msk.f32.mxu1 %vm1129_vm0, %v1130_v1  ;;  %v1019_v19 = vunpack.i.h.bf16 %v1017_v18  ;;  %v1018_v20 = vunpack.i.l.bf16 %v1017_v18 }
 0x314   :  { %960 = vmatprep.subr.bf16.mxu1 %v1128_v0 }
 0x315   :  { %v982_v21 = vpack.c.bf16 %v1019_v19, %v1018_v20 }
 0x317   :  { %962 = vmatpush3.bf16.msra.mxu1 %v961_v24  ;;  %983 = vmatpush3.bf16.msra.mxu0 %v982_v21 }
 0x318   :  { %963 = vmatprep.subr.bf16.mxu1 %v1128_v0  ;;  %984 = vmatprep.subr.bf16.mxu0 %v1128_v0 }
 0x31a   :  { %v452_v44 = vpop.f32.mrb[4].mxu0 }
 0x31b   :  { %965 = vmatpush3.bf16.msra.mxu1 %v964_v26  ;;  %v875_v47 = vpop.f32.mrb[5].mxu0 }
 0x31c   :  { %966 = vmatprep.subr.bf16.mxu1 %v1128_v0 }
 0x31f   :  { %968 = vmatpush3.bf16.msra.mxu1 %v967_v28 }
 0x320   :  { %969 = vmatprep.subr.bf16.mxu1 %v1128_v0 }
 0x323   :  { %971 = vmatpush3.bf16.msra.mxu1 %v970_v31  ;;  %v671_v31 = vld [vmem:[#allocation5 + $0x68] sm:$0xff] }
 0x324   :  { %972 = vmatprep.subr.bf16.mxu1 %v1128_v0 }
 0x327   :  { %974 = vmatpush3.bf16.msra.mxu1 %v973_v34 }
 0x328   :  { %975 = vmatprep.subr.bf16.mxu1 %v1128_v0 }
 0x32b   :  { %977 = vmatpush3.bf16.msra.mxu1 %v976_v37  ;;  %v991_v37 = vpack.c.bf16 %v674_v36, %v673_v35 }
 0x32c   :  { %978 = vmatprep.subr.bf16.mxu1 %v1128_v0 }
 0x32f   :  { %980 = vmatpush3.bf16.msra.mxu1 %v979_v42 }
 0x3e5   :  { %v346_v48 = vpop.f32.mrb[0].mxu1 }
 0x3e6   :  { %v1299_v49 = vadd.f32 %v773_v43, %v346_v48  ;;  %v862_v50 = vpop.f32.mrb[1].mxu1 }
 0x3e8   :  { %909 = vmatmul.mubr.f32.vlgmr.msra.gmra.mrb[2].mxu1 %v1299_v49 }
 0x4bb   :  { %v522_v52 = vpop.f32.mrb[2].mxu1 }
 0x4bc   :  { %v523_v55 = vadd.f32 %v522_v52, %v452_v44  ;;  %v910_v56 = vpop.f32.mrb[3].mxu1  ;;  %v777_v44 = vld [vmem:[#allocation7 + $0x3] ss:$0 sm:$0xff] }
 0x4be   :  { %v1305_v57 = vadd.f32 %v528_v53, %v523_v55 }
 0x4c0   :  { %v531_v58 = vsel %vm142_vm2, %v1305_v57, 0.0 }
 0x4c1   :  { %v532_v59 = vrot.slane %v531_v58, 4 }
 0x4c3   :  { %v533_v60 = vadd.f32 %v532_v59, %v531_v58 }
 0x4c5   :  { %v534_v61 = vrot.slane %v533_v60, 2 }
 0x4c7   :  { %v535_v62 = vadd.f32 %v534_v61, %v533_v60 }
 0x4c9   :  { %v536_v63 = vrot.slane %v535_v62, 1 }
 0x4cb   :  { %v537_v2 = vadd.f32 %v536_v63, %v535_v62 }
 0x4cd   :  { %v538_v3 = vmul.f32 0.125, %v537_v2 }
 0x4cf   :  { %v539_v38 = vsub.f32 %v1305_v57, %v538_v3 }
 0x4d1   :  { %v540_v39 = vmul.f32 %v539_v38, %v539_v38 }
 0x4d3   :  { %v541_v5 = vsel %vm142_vm2, %v540_v39, 0.0 }
 0x4d4   :  { %v542_v6 = vrot.slane %v541_v5, 4 }
 0x4d6   :  { %v543_v8 = vadd.f32 %v542_v6, %v541_v5 }
 0x4d8   :  { %v544_v9 = vrot.slane %v543_v8, 2 }
 0x4da   :  { %v545_v10 = vadd.f32 %v544_v9, %v543_v8 }
 0x4dc   :  { %v546_v12 = vrot.slane %v545_v10, 1 }
 0x4de   :  { %v547_v4 = vadd.f32 %v546_v12, %v545_v10 }
 0x4e0   :  { %v548_v7 = vmul.f32 0.125, %v547_v4 }
 0x4e2   :  { %v549_v16 = vadd.f32 1e-05, %v548_v7 }
 0x4e4   :  { %1027 = vrsqrt.f32 %v549_v16 }
 0x4ee   :  { %v1028_v22 = vpop.eup %1027 }
 0x4ef   :  { %v555_v23 = vmul.f32 %v1028_v22, %v553_v15 }
 0x4f1   :  { %v556_v24 = vmul.f32 %v555_v23, %v538_v3  ;;  %v565_v45 = vrot.slane %v555_v23, %v1224_v14 }
 0x4f3   :  { %558 = vrot.lane.b32.xlu0 %v556_v24, %s1132_s21  ;;  %v566_v46 = vmul.f32 %v565_v45, %v1305_v57 }
 0x4f7   :  { %1021 = vrot.lane.b32.xlu0 %v1020_v17, %s1132_s21 }
 0x4fb   :  { %594 = vrot.lane.b32.xlu0 %v1279_v13, %s1132_s21  ;;  %v672_v13 = vld [vmem:[#allocation5 + $0x70] sm:$0xff] }
 0x565   :  { %v559_v25 = vpop.permute.xlu0 %558 }
 0x566   :  { %v561_v26 = vsub.f32 %v1261_v54, %v559_v25  ;;  %v988_v54 = vpack.c.bf16 %v672_v13, %v671_v31 }
 0x568   :  { %v570_v11 = vrot.slane %v561_v26, %v1224_v14 }
 0x569   :  { %v1022_v27 = vpop.permute.xlu0 %1021 }
 0x56a   :  { %572 = vrot.lane.b32.xlu1 %v570_v11, %s1133_s22  ;;  %v1024_v28 = vunpack.i.h.bf16 %v1022_v27  ;;  %v1023_v29 = vunpack.i.l.bf16 %v1022_v27 }
 0x56c   :  { %v985_v30 = vpack.c.bf16 %v1024_v28, %v1023_v29 }
 0x56d   :  { %v595_v14 = vpop.permute.xlu0 %594 }
 0x56e   :  { %986 = vmatpush3.bf16.msra.mxu0 %v985_v30 }
 0x56f   :  { %987 = vmatprep.subr.bf16.mxu0 %v1128_v0 }
 0x5dc   :  { %v573_v32 = vpop.permute.xlu1 %572 }
 0x5dd   :  { %v575_v33 = vadd.f32 %v573_v32, %v566_v46 }
 0x5df   :  { %v576_v34 = vmax.f32 %v575_v33, 0.0 }
 0x5e1   :  { %920 = vmatmul.mubr.msk.f32.vlgmr.msra.gmra.mrb[6].mxu0 %vm142_vm2, %v576_v34 }
 0x5e2   :  { %989 = vmatpush3.bf16.msra.mxu0 %v988_v54  ;;  %930 = vmatprep.mubr.msk.f32.mxu0 %vm1129_vm0, %v1130_v1 }
 0x5e3   :  { %990 = vmatprep.subr.bf16.mxu0 %v1128_v0 }
 0x5e6   :  { %992 = vmatpush3.bf16.msra.mxu0 %v991_v37 }
 0x6b4   :  { %v666_v40 = vpop.f32.mrb[6].mxu0 }
 0x6b5   :  { %v667_v41 = vadd.f32 %v666_v40, %v595_v14  ;;  %v921_v42 = vpop.f32.mrb[7].mxu0 }
 0x6b7   :  { %v670_v43 = vadd.f32 %v667_v41, %v1305_v57 }
 0x6b9   :  { %931 = vmatmul.mubr.msk.f32.vlgmr.msra.gmra.mrb[8].mxu0 %vm142_vm2, %v670_v43 }
 0x78c   :  { %v749_v47 = vpop.f32.mrb[8].mxu0 }
 0x78d   :  { %v750_v48 = vadd.f32 %v777_v44, %v749_v47  ;;  %v932_v1 = vpop.f32.mrb[9].mxu0 }
 0x78f   :  { %v753_v0 = vadd.f32 %v750_v48, %v1299_v49 }
 0x791   :  { %754 = vst [vmem:[#allocation8] sm:$0xff] %v753_v0 }
 0x792   :  { %1106 = shalt.err (!%p1103_p0)
}
 0x793   :  { %s1107_s28 = scalar_lea.hbm %s1346_s3, 128 }
 0x794   :  { %p1108_p1 = scmp.ne.s32.totalorder %s1346_s3, %s1107_s28  ;;  %p1111_p2 = scmp.lt.u32.totalorder %s1107_s28, %s1346_s3 }
 0x796   :  { %p1113_p3 = pnand %p1111_p2, %p1108_p1 }
 0x798   :  { %1116 = shalt.err (!%p1113_p3)
}
 0x799   :  { %764 = dma.vmem_to_hbm [thread:$0]  %s762_s24, 128, %s1346_s3, [#allocation4]  }
 0x79a   :  { %1121 = dma.done.wait [#allocation4], 128  }
 0x79b   :  { %1122 = vsyncadd [#allocation4], 4294967168 }
 0x79c   :  { %768 = vsyncpa [#allocation3], 1 }
 0x79d   :  { %769 = vsyncpa [#allocation6], 1 }
 0x79e   :  { %770 = vsyncpa [#allocation4], 1 }

</bundles_post_ra>
